<compile_context>
chip_gen: v7x
topology: tpu7x:2x2x1
jax: 0.10.0
libtpu: 0.0.40
codegen_flags: <defaults>
</compile_context>

<pallas_src>
import math

import jax
import jax.numpy as jnp
from jax import lax
from jax.experimental import pallas as pl
from jax.experimental.pallas import tpu as pltpu


def _round_up(x, m):
    return (x + m - 1) // m * m


def _down_proj_kernel(x_ref, a_ref, mid_ref, acc_ref):
    """mid = x @ A, accumulated over the K grid axis."""
    k = pl.program_id(1)

    @pl.when(k == 0)
    def _init():
        acc_ref[...] = jnp.zeros_like(acc_ref)

    acc_ref[...] += jnp.dot(x_ref[...], a_ref[...],
                            preferred_element_type=jnp.float32)   # (tm, rp)

    @pl.when(k == pl.num_programs(1) - 1)
    def _finalize():
        mid_ref[...] = acc_ref[...].astype(mid_ref.dtype)


def _lora_kernel(x_ref, w_ref, bias_ref, mid_ref, b_ref, o_ref, acc_ref):
    """y = x @ W^T (+ bias + mid @ B on the last K step)."""
    k = pl.program_id(2)

    @pl.when(k == 0)
    def _init():
        acc_ref[...] = jnp.zeros_like(acc_ref)

    # Base matmul: x (tm, tk) contracted with W block (tn, tk) on the K axis
    # (x @ W^T without materializing a transposed weight in HBM).
    acc_ref[...] += lax.dot_general(
        x_ref[...], w_ref[...],
        dimension_numbers=(((1,), (1,)), ((), ())),
        preferred_element_type=jnp.float32)          # (tm, tn)

    @pl.when(k == pl.num_programs(2) - 1)
    def _finalize():
        lora = jnp.dot(mid_ref[...], b_ref[...],
                       preferred_element_type=jnp.float32)        # (tm, tn)
        o_ref[...] = (acc_ref[...] + bias_ref[...] + lora).astype(o_ref.dtype)


def lora_forward(x, w, bias, a, b, *, tm=256, tn=256, tk=512, compute_dtype=None):
    """LoRA forward pass.

    x:    [M, in_features]
    w:    [out_features, in_features]   (PyTorch nn.Linear weight layout)
    bias: [out_features]
    a:    [in_features, rank]
    b:    [rank, out_features]
    returns [M, out_features] in x's original dtype.
    """
    M, K = x.shape
    N, K2 = w.shape
    assert K2 == K, "weight in_features mismatch"
    r = a.shape[1]

    out_dtype = x.dtype
    if compute_dtype is not None:
        x = x.astype(compute_dtype)
        w = w.astype(compute_dtype)
        a = a.astype(compute_dtype)
        b = b.astype(compute_dtype)

    # bf16 packs 16 rows per sublane tile; f32 packs 8.
    sub = 16 if x.dtype == jnp.bfloat16 else 8

    # Clamp tiles to the (padded) problem so small shapes still work.
    tm = min(tm, _round_up(M, sub))
    tn = min(tn, _round_up(N, 128))
    tk = min(tk, _round_up(K, 128))

    Mp = _round_up(M, tm)
    Np = _round_up(N, tn)
    Kp = _round_up(K, tk)
    rp = _round_up(r, 128)          # lane-dense rank (zero padding is exact)

    # Zero padding: padded K contributes 0 to every dot; padded M/N rows/cols
    # are sliced off; padded rank columns of A are zero so B's padded rows
    # never contribute.
    x_p = jnp.pad(x, ((0, Mp - M), (0, Kp - K)))
    w_p = jnp.pad(w, ((0, Np - N), (0, Kp - K)))
    a_p = jnp.pad(a, ((0, Kp - K), (0, rp - r)))
    b_p = jnp.pad(b, ((0, rp - r), (0, Np - N)))
    bias_p = jnp.pad(bias.astype(jnp.float32), (0, Np - N)).reshape(1, Np)

    def _bytes(shape, dt):
        return math.prod(shape) * jnp.dtype(dt).itemsize

    # ---- Kernel 1: mid = x @ A  (computed once per M tile, not per N tile) ---
    mid = pl.pallas_call(
        _down_proj_kernel,
        out_shape=jax.ShapeDtypeStruct((Mp, rp), x_p.dtype),
        grid_spec=pltpu.PrefetchScalarGridSpec(
            num_scalar_prefetch=0,
            grid=(Mp // tm, Kp // tk),
            in_specs=[
                pl.BlockSpec((tm, tk), lambda i, k: (i, k)),      # x tile
                pl.BlockSpec((tk, rp), lambda i, k: (k, 0)),      # A tile
            ],
            out_specs=pl.BlockSpec((tm, rp), lambda i, k: (i, 0)),
            scratch_shapes=[pltpu.VMEM((tm, rp), jnp.float32)],
        ),
        compiler_params=pltpu.CompilerParams(
            dimension_semantics=("parallel", "arbitrary"),
        ),
    )(x_p, a_p)

    # ---- Kernel 2: y = x @ W^T + bias + mid @ B ------------------------------
    footprint = (
        2 * (_bytes((tm, tk), x_p.dtype)
             + _bytes((tn, tk), w_p.dtype)
             + _bytes((1, tn), jnp.float32)
             + _bytes((tm, rp), mid.dtype)
             + _bytes((rp, tn), b_p.dtype)
             + _bytes((tm, tn), out_dtype))
        + _bytes((tm, tn), jnp.float32))
    vmem_limit = min(int(1.5 * footprint) + (4 << 20), 48 << 20)

    grid = (Mp // tm, Np // tn, Kp // tk)

    out_p = pl.pallas_call(
        _lora_kernel,
        out_shape=jax.ShapeDtypeStruct((Mp, Np), out_dtype),
        grid_spec=pltpu.PrefetchScalarGridSpec(
            num_scalar_prefetch=0,
            grid=grid,
            in_specs=[
                pl.BlockSpec((tm, tk), lambda i, j, k: (i, k)),   # x tile
                pl.BlockSpec((tn, tk), lambda i, j, k: (j, k)),   # W tile [out, in]
                pl.BlockSpec((1, tn), lambda i, j, k: (0, j)),    # bias tile
                pl.BlockSpec((tm, rp), lambda i, j, k: (i, 0)),   # mid tile (dedup'd DMA)
                pl.BlockSpec((rp, tn), lambda i, j, k: (0, j)),   # B tile
            ],
            out_specs=pl.BlockSpec((tm, tn), lambda i, j, k: (i, j)),
            scratch_shapes=[
                pltpu.VMEM((tm, tn), jnp.float32),   # base-matmul accumulator
            ],
        ),
        compiler_params=pltpu.CompilerParams(
            dimension_semantics=("parallel", "parallel", "arbitrary"),
            vmem_limit_bytes=vmem_limit,
        ),
    )(x_p, w_p, bias_p, mid, b_p)

    return out_p[:M, :N]


if __name__ == "__main__":
    # Small shapes consistent with the module: M tokens, hidden 32, rank 8.
    M, in_features, out_features, rank = 16, 32, 32, 8

    key = jax.random.PRNGKey(0)
    kx, kw, kb, ka, kB = jax.random.split(key, 5)

    x = jax.random.normal(kx, (M, in_features), dtype=jnp.float32)
    # original_layer (nn.Linear) params.
    w = jax.random.normal(kw, (out_features, in_features), dtype=jnp.float32) * 0.1
    bias = jax.random.normal(kb, (out_features,), dtype=jnp.float32) * 0.1
    # LoRA params. NOTE: PyTorch __init__ sets A to zeros; small random values
    # here so the LoRA path is actually exercised.
    a = jax.random.normal(ka, (in_features, rank), dtype=jnp.float32) * 0.01
    B = jax.random.normal(kB, (rank, out_features), dtype=jnp.float32)

    ref = x @ w.T + bias + (x @ a) @ B

    # f32 run (strict check).
    out = jax.block_until_ready(lora_forward(x, w, bias, a, B))
    assert out.shape == ref.shape
    assert jnp.allclose(out, ref, atol=1e-4, rtol=1e-4), "f32 mismatch vs reference"

    # bf16 compute mode (MXU-friendly on v6e/v7x), looser tolerance.
    out_bf16 = jax.block_until_ready(
        lora_forward(x, w, bias, a, B, compute_dtype=jnp.bfloat16))
    assert jnp.allclose(out_bf16, ref, atol=3e-2, rtol=3e-2), "bf16 mismatch vs reference"

    print("KERNEL_OK")
</pallas_src>

<mosaic_0001>
module attributes {stable_mosaic.version = 11 : i64} {
  func.func @_down_proj_kernel(%arg0: i32, %arg1: i32, %arg2: memref<16x128xf32, #tpu.memory_space<vmem>>, %arg3: memref<128x128xf32, #tpu.memory_space<vmem>>, %arg4: memref<16x128xf32, #tpu.memory_space<vmem>>, %arg5: memref<16x128xf32, #tpu.memory_space<vmem>>) attributes {dimension_semantics = [#tpu.dimension_semantics<parallel>, #tpu.dimension_semantics<arbitrary>], iteration_bounds = array<i64: 1, 1>, scalar_prefetch = 0 : i64, scratch_operands = 1 : i64, tpu.core_type = #tpu.core_type<tc>, window_params = [{transform_indices = @transform_0, window_bounds = array<i64: 16, 128>}, {transform_indices = @transform_1, window_bounds = array<i64: 128, 128>}, {transform_indices = @transform_2, window_bounds = array<i64: 16, 128>}]} {
    %c0_i32 = arith.constant 0 : i32
    %0 = arith.cmpi eq, %arg1, %c0_i32 : i32
    %1 = arith.extui %0 : i1 to i32
    %c0_i32_0 = arith.constant 0 : i32
    %2 = arith.cmpi ne, %1, %c0_i32_0 : i32
    scf.if %2 {
      %cst_10 = arith.constant 0.000000e+00 : f32
      %12 = vector.broadcast %cst_10 : f32 to vector<16x128xf32>
      %c0_11 = arith.constant 0 : index
      %c0_12 = arith.constant 0 : index
      %13 = vector.load %arg5[%c0_11, %c0_12] : memref<16x128xf32, #tpu.memory_space<vmem>>, vector<16x128xf32>
      tpu.vector_store %arg5[%c0_11, %c0_12], %12 {strides = array<i32>} : memref<16x128xf32, #tpu.memory_space<vmem>>, vector<16x128xf32>,
    } else {
    }
    %c0 = arith.constant 0 : index
    %c0_1 = arith.constant 0 : index
    %3 = vector.load %arg5[%c0, %c0_1] : memref<16x128xf32, #tpu.memory_space<vmem>>, vector<16x128xf32>
    %c0_2 = arith.constant 0 : index
    %c0_3 = arith.constant 0 : index
    %4 = vector.load %arg2[%c0_2, %c0_3] : memref<16x128xf32, #tpu.memory_space<vmem>>, vector<16x128xf32>
    %c0_4 = arith.constant 0 : index
    %c0_5 = arith.constant 0 : index
    %5 = vector.load %arg3[%c0_4, %c0_5] : memref<128x128xf32, #tpu.memory_space<vmem>>, vector<128x128xf32>
    %cst = arith.constant dense<0.000000e+00> : vector<16x128xf32>
    %6 = tpu.matmul %4, %5, %cst {dimension_numbers = #tpu.dot_dimension_numbers<[1], [0], [0], [1], [0, 0, 1, 1], [], []>} : vector<16x128xf32>, vector<128x128xf32>, vector<16x128xf32> -> vector<16x128xf32>
    %7 = arith.addf %3, %6 : vector<16x128xf32>
    %c0_6 = arith.constant 0 : index
    %c0_7 = arith.constant 0 : index
    %8 = vector.load %arg5[%c0_6, %c0_7] : memref<16x128xf32, #tpu.memory_space<vmem>>, vector<16x128xf32>
    tpu.vector_store %arg5[%c0_6, %c0_7], %7 {strides = array<i32>} : memref<16x128xf32, #tpu.memory_space<vmem>>, vector<16x128xf32>,
    %c0_i32_8 = arith.constant 0 : i32
    %9 = arith.cmpi eq, %arg1, %c0_i32_8 : i32
    %10 = arith.extui %9 : i1 to i32
    %c0_i32_9 = arith.constant 0 : i32
    %11 = arith.cmpi ne, %10, %c0_i32_9 : i32
    scf.if %11 {
      %c0_10 = arith.constant 0 : index
      %c0_11 = arith.constant 0 : index
      %12 = vector.load %arg5[%c0_10, %c0_11] : memref<16x128xf32, #tpu.memory_space<vmem>>, vector<16x128xf32>
      %c0_12 = arith.constant 0 : index
      %c0_13 = arith.constant 0 : index
      %13 = vector.load %arg4[%c0_12, %c0_13] : memref<16x128xf32, #tpu.memory_space<vmem>>, vector<16x128xf32>
      tpu.vector_store %arg4[%c0_12, %c0_13], %12 {strides = array<i32>} : memref<16x128xf32, #tpu.memory_space<vmem>>, vector<16x128xf32>,
    } else {
    }
    return
  }
  func.func @transform_0(%arg0: i32, %arg1: i32) -> (i32, i32) {
    %c0_i32 = arith.constant 0 : i32
    return %arg0, %arg1 : i32, i32
  }
  func.func @transform_1(%arg0: i32, %arg1: i32) -> (i32, i32) {
    %c0_i32 = arith.constant 0 : i32
    %c0_i32_0 = arith.constant 0 : i32
    return %arg1, %c0_i32 : i32, i32
  }
  func.func @transform_2(%arg0: i32, %arg1: i32) -> (i32, i32) {
    %c0_i32 = arith.constant 0 : i32
    %c0_i32_0 = arith.constant 0 : i32
    return %arg0, %c0_i32 : i32, i32
  }
}

</mosaic_0001>

<bundles_post_ra>
// kernel: tpu_custom_call.1
= control target key start
LH: loop header
LB: loop body
LE: loop exit
PB: predicated region body
PF: predicated region fallthrough
CT: control target
= control target key end

     0   :  { %7 = vsyncpa [#allocation4], 0  ;;  %s397_s0 = inlined_call_operand.hbm [shape: f32[16,128], index: 0, kind: input, shape index: {}]   ;;  %s398_s1 = inlined_call_operand.hbm [shape: f32[128,128], index: 1, kind: input, shape index: {}]   ;;  %s399_s2 = inlined_call_operand.hbm [shape: f32[16,128], index: 2, kind: output, shape index: {}]  }
   0x1   :  { %8 = vsyncpa [#allocation7], 0 }
   0x2   :  { %9 = vsyncpa [#allocation5], 0  ;;  %s332_s9 = smov [#allocation3]   ;;  %s260_s13 = scalar_lea.hbm %s397_s0, 256 }
   0x3   :  { %s15_s10 = sshll.u32 %s332_s9, 4  ;;  %p261_p0 = scmp.ne.s32.totalorder %s397_s0, %s260_s13  ;;  %s16_s10 = int_to_ptr.vmem [resolvable:$true] %s15_s10 }
   0x4   :  { %p264_p1 = scmp.lt.u32.totalorder %s260_s13, %s397_s0 }
   0x6   :  { %p266_p2 = pnand %p264_p1, %p261_p0 }
   0x8   :  { %269 = shalt.err (!%p266_p2)
}
   0x9   :  { %s270_s18 = scalar_lea.vmem %s16_s10, 256  ;;  %p275_p4 = scmp.lt.s32.totalorder %s16_s10, %s16_s10 }
   0xa   :  { %p271_p3 = scmp.ne.s32.totalorder %s16_s10, %s270_s18  ;;  %p276_p5 = scmp.lt.s32.totalorder %s270_s18, %s270_s18 }
   0xc   :  { %p277_p6 = por %p276_p5, %p275_p4 }
   0xe   :  { %p278_p7 = pnand %p277_p6, %p271_p3 }
  0x10   :  { %281 = shalt.err (!%p278_p7)
}
  0x11   :  { %s333_s19 = smov 128   ;;  %s334_s20 = smov 8  }
  0x12   :  { %21 = dma.hbm_to_vmem [thread:$0]  %s397_s0, 256, %s16_s10, [#allocation4], %s333_s19, %s333_s19, %s334_s20  }
  0x13   :  { %s335_s23 = smov [#allocation6]   ;;  %s282_s27 = scalar_lea.hbm %s398_s1, 2048 }
  0x14   :  { %s27_s24 = sshll.u32 %s335_s23, 4  ;;  %p283_p8 = scmp.ne.s32.totalorder %s398_s1, %s282_s27  ;;  %s28_s24 = int_to_ptr.vmem [resolvable:$true] %s27_s24 }
  0x15   :  { %p286_p9 = scmp.lt.u32.totalorder %s282_s27, %s398_s1 }
  0x17   :  { %p288_p10 = pnand %p286_p9, %p283_p8 }
  0x19   :  { %291 = shalt.err (!%p288_p10)
}
  0x1a   :  { %s292_s4 = scalar_lea.vmem %s28_s24, 2048  ;;  %p297_p12 = scmp.lt.s32.totalorder %s28_s24, %s28_s24 }
  0x1b   :  { %p293_p11 = scmp.ne.s32.totalorder %s28_s24, %s292_s4  ;;  %p298_p13 = scmp.lt.s32.totalorder %s292_s4, %s292_s4 }
  0x1d   :  { %p299_p0 = por %p298_p13, %p297_p12 }
  0x1f   :  { %p300_p1 = pnand %p299_p0, %p293_p11 }
  0x21   :  { %303 = shalt.err (!%p300_p1)
}
  0x22   :  { %33 = dma.hbm_to_vmem [thread:$0]  %s398_s1, 2048, %s28_s24, [#allocation7], %s333_s19, %s333_s19, %s334_s20  }
  0x23   :  { %326 = dma.done.wait [#allocation4], 256  }
  0x24   :  { %327 = vsyncadd [#allocation4], 4294967040 }
  0x25   :  { %328 = dma.done.wait [#allocation7], 2048  }
  0x26   :  { %329 = vsyncadd [#allocation7], 4294965248  ;;  %v50_v0 = vld [vmem:[#allocation6] sm:$0xff]  ;;  %v51_v1 = vld [vmem:[#allocation6 + $0x8] sm:$0xff]  ;;  %s336_s1 = smov [#allocation8]  }
  0x27   :  { %v52_v2 = vld [vmem:[#allocation6 + $0x10] sm:$0xff]  ;;  %v223_v3 = vpack.c.bf16 %v51_v1, %v50_v0  ;;  %v53_v4 = vld [vmem:[#allocation6 + $0x18] sm:$0xff]  ;;  %v54_v6 = vld [vmem:[#allocation6 + $0x20] sm:$0xff]  ;;  %s157_s6 = sshll.u32 %s336_s1, 4  ;;  %s158_s6 = int_to_ptr.vmem [resolvable:$true] %s157_s6 }
  0x28   :  { %v227_v5 = vpack.c.bf16 %v53_v4, %v52_v2  ;;  %v55_v7 = vld [vmem:[#allocation6 + $0x28] sm:$0xff]  ;;  %v48_v9 = vld [vmem:[#allocation3] sm:$0xff]  ;;  %v57_v11 = vld [vmem:[#allocation6 + $0x38] sm:$0xff]  ;;  %s304_s7 = scalar_lea.vmem %s158_s6, 256  ;;  %p309_p3 = scmp.lt.s32.totalorder %s158_s6, %s158_s6 }
  0x29   :  { %224 = vmatprep.subr.bf16.mxu0 %v223_v3  ;;  %v231_v8 = vpack.c.bf16 %v55_v7, %v54_v6  ;;  %v56_v10 = vld [vmem:[#allocation6 + $0x30] sm:$0xff]  ;;  %220 = vmatprep.mubr.f32.mxu0 %v48_v9  ;;  %v58_v13 = vld [vmem:[#allocation6 + $0x40] sm:$0xff]  ;;  %v59_v14 = vld [vmem:[#allocation6 + $0x48] sm:$0xff]  ;;  %p305_p2 = scmp.ne.s32.totalorder %s158_s6, %s304_s7  ;;  %p310_p4 = scmp.lt.s32.totalorder %s304_s7, %s304_s7 }
  0x2a   :  { %226 = vmatpush3.bf16.msra.mxu0 %v223_v3  ;;  %v235_v12 = vpack.c.bf16 %v57_v11, %v56_v10  ;;  %v239_v15 = vpack.c.bf16 %v59_v14, %v58_v13  ;;  %v60_v16 = vld [vmem:[#allocation6 + $0x50] sm:$0xff]  ;;  %v61_v17 = vld [vmem:[#allocation6 + $0x58] sm:$0xff]  ;;  %v62_v19 = vld [vmem:[#allocation6 + $0x60] sm:$0xff] }
  0x2b   :  { %228 = vmatprep.subr.bf16.mxu0 %v227_v5  ;;  %v243_v18 = vpack.c.bf16 %v61_v17, %v60_v16  ;;  %v63_v20 = vld [vmem:[#allocation6 + $0x68] sm:$0xff]  ;;  %v64_v22 = vld [vmem:[#allocation6 + $0x70] sm:$0xff]  ;;  %v65_v23 = vld [vmem:[#allocation6 + $0x78] sm:$0xff]  ;;  %p311_p5 = por %p310_p4, %p309_p3 }
  0x2c   :  { %v247_v21 = vpack.c.bf16 %v63_v20, %v62_v19  ;;  %v251_v24 = vpack.c.bf16 %v65_v23, %v64_v22  ;;  %v49_v25 = vld [vmem:[#allocation3 + $0x8] sm:$0xff] }
  0x2d   :  { %p312_p6 = pnand %p311_p5, %p305_p2 }
  0x2e   :  { %230 = vmatpush3.bf16.msra.mxu0 %v227_v5 }
  0x2f   :  { %232 = vmatprep.subr.bf16.mxu0 %v231_v8 }
  0x32   :  { %234 = vmatpush3.bf16.msra.mxu0 %v231_v8 }
  0x33   :  { %236 = vmatprep.subr.bf16.mxu0 %v235_v12 }
  0x36   :  { %238 = vmatpush3.bf16.msra.mxu0 %v235_v12 }
  0x37   :  { %240 = vmatprep.subr.bf16.mxu0 %v239_v15 }
  0x3a   :  { %242 = vmatpush3.bf16.msra.mxu0 %v239_v15 }
  0x3b   :  { %244 = vmatprep.subr.bf16.mxu0 %v243_v18 }
  0x3e   :  { %246 = vmatpush3.bf16.msra.mxu0 %v243_v18 }
  0x3f   :  { %248 = vmatprep.subr.bf16.mxu0 %v247_v21 }
  0x42   :  { %250 = vmatpush3.bf16.msra.mxu0 %v247_v21 }
  0x43   :  { %252 = vmatprep.subr.bf16.mxu0 %v251_v24 }
  0x46   :  { %254 = vmatpush3.bf16.msra.mxu0 %v251_v24 }
  0x49   :  { %221 = vmatmul.mubr.f32.vlgmr.msra.gmra.mrb[0].mxu0 %v49_v25 }
 0x11c   :  { %v222_v26 = vpop.f32.mrb[0].mxu0 }
 0x11d   :  { %151 = vst [vmem:[#allocation8 + $0x8] sm:$0xff] %v222_v26  ;;  %v132_v27 = vpop.f32.mrb[1].mxu0 }
 0x11e   :  { %150 = vst [vmem:[#allocation8] sm:$0xff] %v132_v27 }
 0x11f   :  { %315 = shalt.err (!%p312_p6)
}
 0x120   :  { %s316_s10 = scalar_lea.hbm %s399_s2, 256 }
 0x121   :  { %p317_p7 = scmp.ne.s32.totalorder %s399_s2, %s316_s10  ;;  %p320_p8 = scmp.lt.u32.totalorder %s316_s10, %s399_s2 }
 0x123   :  { %p322_p9 = pnand %p320_p8, %p317_p7 }
 0x125   :  { %325 = shalt.err (!%p322_p9)
}
 0x126   :  { %163 = dma.vmem_to_hbm [thread:$0]  %s158_s6, 256, %s399_s2, [#allocation5], %s333_s19, %s333_s19, %s334_s20  }
 0x127   :  { %330 = dma.done.wait [#allocation5], 256  }
 0x128   :  { %331 = vsyncadd [#allocation5], 4294967040 }
 0x129   :  { %167 = vsyncpa [#allocation4], 1 }
 0x12a   :  { %168 = vsyncpa [#allocation7], 1 }
 0x12b   :  { %169 = vsyncpa [#allocation5], 1 }

</bundles_post_ra>
